<compile_context>
chip_gen: v7x
topology: tpu7x:2x2x1
jax: 0.10.0
libtpu: 0.0.40
codegen_flags: <defaults>
</compile_context>

<pallas_src>
import jax
import jax.numpy as jnp
from jax.experimental import pallas as pl
from jax.experimental.pallas import tpu as pltpu


def _round_up(x, m):
    return (x + m - 1) // m * m


# ---------------------------------------------------------------------------
# Kernel 1: fused 1x1 conv (no bias) + eval-mode BatchNorm (scale/shift) + ReLU
# ---------------------------------------------------------------------------
def _conv1x1_bn_relu_kernel(x_ref, w_ref, scale_ref, shift_ref, o_ref):
    # x_ref:     (cin_p, tile_hw)   one image's channel x spatial tile
    # w_ref:     (cout_p, cin_p)    1x1 conv weight
    # scale_ref: (cout_p, 1)        folded BN scale  = gamma / sqrt(var + eps)
    # shift_ref: (cout_p, 1)        folded BN shift  = beta - mean * scale
    # o_ref:     (cout_p, tile_hw)
    x = x_ref[...].astype(jnp.float32)
    w = w_ref[...].astype(jnp.float32)
    cin_p = x.shape[0]
    if cin_p <= 16:
        # Tiny contraction (test shapes): unrolled VPU broadcast-FMA in exact f32;
        # the MXU would be mostly idle at K this small.
        y = jnp.zeros((w.shape[0], x.shape[1]), jnp.float32)
        for ci in range(cin_p):
            y = y + w[:, ci:ci + 1] * x[ci:ci + 1, :]
    else:
        # Realistic channel counts: MXU matmul with f32 accumulation.
        y = jnp.dot(w, x, preferred_element_type=jnp.float32)
    y = y * scale_ref[...] + shift_ref[...]
    o_ref[...] = jnp.maximum(y, 0.0).astype(o_ref.dtype)


def conv1x1_bn_relu(x, w, scale, shift, *, tile_hw_max=2048):
    """Fused nn.Conv2d(k=1, bias=False) + BatchNorm2d(eval) + ReLU.  x: NCHW."""
    n, cin, h, wd = x.shape
    cout = w.shape[0]
    hw = h * wd

    cin_p = _round_up(cin, 8)
    cout_p = _round_up(cout, 8)

    # Lane tile: multiple of 128, bounded so one x block stays <= ~2 MiB
    # (double-buffered this is well inside default scoped VMEM on all gens).
    hw_128 = _round_up(hw, 128)
    budget_lanes = max(128, (2 * 1024 * 1024) // (4 * cin_p) // 128 * 128)
    tile_hw = min(hw_128, tile_hw_max, budget_lanes)
    hw_p = _round_up(hw, tile_hw)

    x3 = jnp.pad(x.reshape(n, cin, hw), ((0, 0), (0, cin_p - cin), (0, hw_p - hw)))
    w_p = jnp.pad(w.astype(jnp.float32), ((0, cout_p - cout), (0, cin_p - cin)))
    scale_p = jnp.pad(scale.astype(jnp.float32), (0, cout_p - cout)).reshape(cout_p, 1)
    shift_p = jnp.pad(shift.astype(jnp.float32), (0, cout_p - cout)).reshape(cout_p, 1)

    grid = (n, hw_p // tile_hw)
    out = pl.pallas_call(
        _conv1x1_bn_relu_kernel,
        out_shape=jax.ShapeDtypeStruct((n, cout_p, hw_p), x.dtype),
        grid_spec=pltpu.PrefetchScalarGridSpec(
            num_scalar_prefetch=0,
            grid=grid,
            in_specs=[
                pl.BlockSpec((None, cin_p, tile_hw), lambda i, j: (i, 0, j)),
                pl.BlockSpec((cout_p, cin_p), lambda i, j: (0, 0)),
                pl.BlockSpec((cout_p, 1), lambda i, j: (0, 0)),
                pl.BlockSpec((cout_p, 1), lambda i, j: (0, 0)),
            ],
            out_specs=pl.BlockSpec((None, cout_p, tile_hw), lambda i, j: (i, 0, j)),
        ),
        compiler_params=pltpu.CompilerParams(
            dimension_semantics=("parallel", "parallel"),
        ),
    )(x3, w_p, scale_p, shift_p)

    return out[:, :cout, :hw].reshape(n, cout, h, wd)


# ---------------------------------------------------------------------------
# Kernel 2: AvgPool2d(kernel=3, stride=1, padding=1, count_include_pad=True)
#           fused with the CellBlock residual add (out = avgpool(z) + xa)
# ---------------------------------------------------------------------------
def _avgpool3x3_add_kernel(zp_ref, xa_ref, o_ref):
    # zp_ref: (tile_nc, H+2, W+2)  zero-padded conv-branch output
    # xa_ref: (tile_nc, H, W)      op1 branch output (residual term)
    # o_ref:  (tile_nc, H, W)
    h = o_ref.shape[1]
    w = o_ref.shape[2]
    zp = zp_ref[...].astype(jnp.float32)
    s = zp[:, 0:h, 0:w]
    for dy in range(3):
        for dx in range(3):
            if dy == 0 and dx == 0:
                continue
            s = s + zp[:, dy:dy + h, dx:dx + w]
    o_ref[...] = (s * (1.0 / 9.0) + xa_ref[...].astype(jnp.float32)).astype(o_ref.dtype)


def avgpool3x3_add(z, xa, *, tile_nc_max=64):
    """out = AvgPool2d(3, stride=1, pad=1)(z) + xa   (both NCHW)."""
    n, c, h, w = z.shape
    nc = n * c
    tile_nc = min(_round_up(nc, 8), tile_nc_max)
    nc_p = _round_up(nc, tile_nc)

    zp = jnp.pad(z.reshape(nc, h, w), ((0, nc_p - nc), (1, 1), (1, 1)))
    xa3 = jnp.pad(xa.reshape(nc, h, w), ((0, nc_p - nc), (0, 0), (0, 0)))

    grid = (nc_p // tile_nc,)
    out = pl.pallas_call(
        _avgpool3x3_add_kernel,
        out_shape=jax.ShapeDtypeStruct((nc_p, h, w), z.dtype),
        grid_spec=pltpu.PrefetchScalarGridSpec(
            num_scalar_prefetch=0,
            grid=grid,
            in_specs=[
                pl.BlockSpec((tile_nc, h + 2, w + 2), lambda i: (i, 0, 0)),
                pl.BlockSpec((tile_nc, h, w), lambda i: (i, 0, 0)),
            ],
            out_specs=pl.BlockSpec((tile_nc, h, w), lambda i: (i, 0, 0)),
        ),
        compiler_params=pltpu.CompilerParams(
            dimension_semantics=("parallel",),
        ),
    )(zp, xa3)

    return out[:nc].reshape(n, c, h, w)


# ---------------------------------------------------------------------------
# CellBlock.forward (inference): op1='I', op2='3x3 avgpool', DropPath=identity
# ---------------------------------------------------------------------------
def cell_block_forward(x1, x2, w1, scale1, shift1, w2, scale2, shift2):
    # op1: 1x1 conv + BN + ReLU, then IdentityModule
    xa = conv1x1_bn_relu(x1, w1, scale1, shift1)
    # op2: PoolBranch('avg'): 1x1 conv + BN + ReLU, then AvgPool2d(3, 1, 1)
    z = conv1x1_bn_relu(x2, w2, scale2, shift2)
    # DropPath at inference is identity; final xa + xb add is fused into the pool kernel.
    return avgpool3x3_add(z, xa)


# ---------------------------------------------------------------------------
# Pure-JAX reference of the torch forward (inference mode)
# ---------------------------------------------------------------------------
def _ref_conv1x1_bn_relu(x, w, scale, shift):
    y = jnp.einsum("oc,nchw->nohw", w, x, precision=jax.lax.Precision.HIGHEST)
    y = y * scale[None, :, None, None] + shift[None, :, None, None]
    return jnp.maximum(y, 0.0)


def _ref_avgpool3x3(x):
    s = jax.lax.reduce_window(
        x, 0.0, jax.lax.add,
        window_dimensions=(1, 1, 3, 3),
        window_strides=(1, 1, 1, 1),
        padding=((0, 0), (0, 0), (1, 1), (1, 1)),
    )
    return s / 9.0


if __name__ == "__main__":
    key = jax.random.PRNGKey(0)
    N, C, H, W = 2, 4, 16, 16  # args.planes = 4
    k = jax.random.split(key, 12)

    x1 = jax.random.normal(k[0], (N, C, H, W), dtype=jnp.float32)
    x2 = jax.random.normal(k[1], (N, C, H, W), dtype=jnp.float32)

    # 1x1 conv weights (Cout, Cin)
    w1 = jax.random.normal(k[2], (C, C), dtype=jnp.float32) / jnp.sqrt(C)
    w2 = jax.random.normal(k[3], (C, C), dtype=jnp.float32) / jnp.sqrt(C)

    # Eval-mode BatchNorm folded into per-channel scale/shift.
    def bn_fold(kg, kb, km, kv, c):
        gamma = 1.0 + 0.1 * jax.random.normal(kg, (c,), jnp.float32)
        beta = 0.1 * jax.random.normal(kb, (c,), jnp.float32)
        mean = 0.1 * jax.random.normal(km, (c,), jnp.float32)
        var = jnp.abs(jax.random.normal(kv, (c,), jnp.float32)) + 0.5
        scale = gamma * jax.lax.rsqrt(var + 1e-5)
        return scale, beta - mean * scale

    s1, b1 = bn_fold(k[4], k[5], k[6], k[7], C)
    s2, b2 = bn_fold(k[8], k[9], k[10], k[11], C)

    y = cell_block_forward(x1, x2, w1, s1, b1, w2, s2, b2)
    jax.block_until_ready(y)

    # Reference
    xa_ref = _ref_conv1x1_bn_relu(x1, w1, s1, b1)
    z_ref = _ref_conv1x1_bn_relu(x2, w2, s2, b2)
    y_ref = xa_ref + _ref_avgpool3x3(z_ref)

    assert y.shape == (N, C, H, W), y.shape
    assert jnp.allclose(y, y_ref, atol=1e-4, rtol=1e-4), (
        "mismatch vs reference: max abs err = %g" % float(jnp.max(jnp.abs(y - y_ref)))
    )

    print("KERNEL_OK")
</pallas_src>

<mosaic_0001>
module attributes {stable_mosaic.version = 11 : i64} {
  func.func @_conv1x1_bn_relu_kernel(%arg0: i32, %arg1: i32, %arg2: memref<1x8x256xf32, #tpu.memory_space<vmem>>, %arg3: memref<8x8xf32, #tpu.memory_space<vmem>>, %arg4: memref<8x1xf32, #tpu.memory_space<vmem>>, %arg5: memref<8x1xf32, #tpu.memory_space<vmem>>, %arg6: memref<1x8x256xf32, #tpu.memory_space<vmem>>) attributes {dimension_semantics = [#tpu.dimension_semantics<parallel>, #tpu.dimension_semantics<parallel>], iteration_bounds = array<i64: 2, 1>, scalar_prefetch = 0 : i64, scratch_operands = 0 : i64, tpu.core_type = #tpu.core_type<tc>, window_params = [{transform_indices = @transform_0, window_bounds = array<i64: 1, 8, 256>}, {pipeline_mode = #tpu.pipeline_mode<synchronous>, transform_indices = @transform_1, window_bounds = array<i64: 8, 8>}, {pipeline_mode = #tpu.pipeline_mode<synchronous>, transform_indices = @transform_2, window_bounds = array<i64: 8, 1>}, {pipeline_mode = #tpu.pipeline_mode<synchronous>, transform_indices = @transform_3, window_bounds = array<i64: 8, 1>}, {transform_indices = @transform_4, window_bounds = array<i64: 1, 8, 256>}]} {
    %c0 = arith.constant 0 : index
    %c0_0 = arith.constant 0 : index
    %c0_1 = arith.constant 0 : index
    %0 = vector.load %arg2[%c0, %c0_0, %c0_1] : memref<1x8x256xf32, #tpu.memory_space<vmem>>, vector<1x8x256xf32>
    %1 = vector.shape_cast %0 : vector<1x8x256xf32> to vector<8x256xf32>
    %c0_2 = arith.constant 0 : index
    %c0_3 = arith.constant 0 : index
    %2 = vector.load %arg3[%c0_2, %c0_3] : memref<8x8xf32, #tpu.memory_space<vmem>>, vector<8x8xf32>
    %cst = arith.constant 0.000000e+00 : f32
    %3 = vector.broadcast %cst : f32 to vector<8x256xf32>
    %4 = vector.extract_strided_slice %2 {offsets = [0, 0], sizes = [8, 1], strides = [1, 1]} : vector<8x8xf32> to vector<8x1xf32>
    %5 = vector.extract_strided_slice %1 {offsets = [0, 0], sizes = [1, 256], strides = [1, 1]} : vector<8x256xf32> to vector<1x256xf32>
    %6 = vector.broadcast %4 : vector<8x1xf32> to vector<8x256xf32>
    %7 = vector.broadcast %5 : vector<1x256xf32> to vector<8x256xf32>
    %8 = arith.mulf %6, %7 : vector<8x256xf32>
    %9 = arith.addf %3, %8 : vector<8x256xf32>
    %10 = vector.extract_strided_slice %2 {offsets = [0, 1], sizes = [8, 1], strides = [1, 1]} : vector<8x8xf32> to vector<8x1xf32>
    %11 = vector.extract_strided_slice %1 {offsets = [1, 0], sizes = [1, 256], strides = [1, 1]} : vector<8x256xf32> to vector<1x256xf32>
    %12 = vector.broadcast %10 : vector<8x1xf32> to vector<8x256xf32>
    %13 = vector.broadcast %11 : vector<1x256xf32> to vector<8x256xf32>
    %14 = arith.mulf %12, %13 : vector<8x256xf32>
    %15 = arith.addf %9, %14 : vector<8x256xf32>
    %16 = vector.extract_strided_slice %2 {offsets = [0, 2], sizes = [8, 1], strides = [1, 1]} : vector<8x8xf32> to vector<8x1xf32>
    %17 = vector.extract_strided_slice %1 {offsets = [2, 0], sizes = [1, 256], strides = [1, 1]} : vector<8x256xf32> to vector<1x256xf32>
    %18 = vector.broadcast %16 : vector<8x1xf32> to vector<8x256xf32>
    %19 = vector.broadcast %17 : vector<1x256xf32> to vector<8x256xf32>
    %20 = arith.mulf %18, %19 : vector<8x256xf32>
    %21 = arith.addf %15, %20 : vector<8x256xf32>
    %22 = vector.extract_strided_slice %2 {offsets = [0, 3], sizes = [8, 1], strides = [1, 1]} : vector<8x8xf32> to vector<8x1xf32>
    %23 = vector.extract_strided_slice %1 {offsets = [3, 0], sizes = [1, 256], strides = [1, 1]} : vector<8x256xf32> to vector<1x256xf32>
    %24 = vector.broadcast %22 : vector<8x1xf32> to vector<8x256xf32>
    %25 = vector.broadcast %23 : vector<1x256xf32> to vector<8x256xf32>
    %26 = arith.mulf %24, %25 : vector<8x256xf32>
    %27 = arith.addf %21, %26 : vector<8x256xf32>
    %28 = vector.extract_strided_slice %2 {offsets = [0, 4], sizes = [8, 1], strides = [1, 1]} : vector<8x8xf32> to vector<8x1xf32>
    %29 = vector.extract_strided_slice %1 {offsets = [4, 0], sizes = [1, 256], strides = [1, 1]} : vector<8x256xf32> to vector<1x256xf32>
    %30 = vector.broadcast %28 : vector<8x1xf32> to vector<8x256xf32>
    %31 = vector.broadcast %29 : vector<1x256xf32> to vector<8x256xf32>
    %32 = arith.mulf %30, %31 : vector<8x256xf32>
    %33 = arith.addf %27, %32 : vector<8x256xf32>
    %34 = vector.extract_strided_slice %2 {offsets = [0, 5], sizes = [8, 1], strides = [1, 1]} : vector<8x8xf32> to vector<8x1xf32>
    %35 = vector.extract_strided_slice %1 {offsets = [5, 0], sizes = [1, 256], strides = [1, 1]} : vector<8x256xf32> to vector<1x256xf32>
    %36 = vector.broadcast %34 : vector<8x1xf32> to vector<8x256xf32>
    %37 = vector.broadcast %35 : vector<1x256xf32> to vector<8x256xf32>
    %38 = arith.mulf %36, %37 : vector<8x256xf32>
    %39 = arith.addf %33, %38 : vector<8x256xf32>
    %40 = vector.extract_strided_slice %2 {offsets = [0, 6], sizes = [8, 1], strides = [1, 1]} : vector<8x8xf32> to vector<8x1xf32>
    %41 = vector.extract_strided_slice %1 {offsets = [6, 0], sizes = [1, 256], strides = [1, 1]} : vector<8x256xf32> to vector<1x256xf32>
    %42 = vector.broadcast %40 : vector<8x1xf32> to vector<8x256xf32>
    %43 = vector.broadcast %41 : vector<1x256xf32> to vector<8x256xf32>
    %44 = arith.mulf %42, %43 : vector<8x256xf32>
    %45 = arith.addf %39, %44 : vector<8x256xf32>
    %46 = vector.extract_strided_slice %2 {offsets = [0, 7], sizes = [8, 1], strides = [1, 1]} : vector<8x8xf32> to vector<8x1xf32>
    %47 = vector.extract_strided_slice %1 {offsets = [7, 0], sizes = [1, 256], strides = [1, 1]} : vector<8x256xf32> to vector<1x256xf32>
    %48 = vector.broadcast %46 : vector<8x1xf32> to vector<8x256xf32>
    %49 = vector.broadcast %47 : vector<1x256xf32> to vector<8x256xf32>
    %50 = arith.mulf %48, %49 : vector<8x256xf32>
    %51 = arith.addf %45, %50 : vector<8x256xf32>
    %c0_4 = arith.constant 0 : index
    %c0_5 = arith.constant 0 : index
    %52 = vector.load %arg4[%c0_4, %c0_5] : memref<8x1xf32, #tpu.memory_space<vmem>>, vector<8x1xf32>
    %53 = vector.broadcast %52 : vector<8x1xf32> to vector<8x256xf32>
    %54 = arith.mulf %51, %53 : vector<8x256xf32>
    %c0_6 = arith.constant 0 : index
    %c0_7 = arith.constant 0 : index
    %55 = vector.load %arg5[%c0_6, %c0_7] : memref<8x1xf32, #tpu.memory_space<vmem>>, vector<8x1xf32>
    %56 = vector.broadcast %55 : vector<8x1xf32> to vector<8x256xf32>
    %57 = arith.addf %54, %56 : vector<8x256xf32>
    %cst_8 = arith.constant 0.000000e+00 : f32
    %58 = vector.broadcast %cst_8 : f32 to vector<8x256xf32>
    %59 = arith.maximumf %57, %58 : vector<8x256xf32>
    %c0_9 = arith.constant 0 : index
    %c0_10 = arith.constant 0 : index
    %c0_11 = arith.constant 0 : index
    %60 = vector.load %arg6[%c0_9, %c0_10, %c0_11] : memref<1x8x256xf32, #tpu.memory_space<vmem>>, vector<1x8x256xf32>
    %61 = vector.shape_cast %60 : vector<1x8x256xf32> to vector<8x256xf32>
    %62 = vector.shape_cast %59 : vector<8x256xf32> to vector<1x8x256xf32>
    tpu.vector_store %arg6[%c0_9, %c0_10, %c0_11], %62 {strides = array<i32>} : memref<1x8x256xf32, #tpu.memory_space<vmem>>, vector<1x8x256xf32>,
    return
  }
  func.func @transform_0(%arg0: i32, %arg1: i32) -> (i32, i32, i32) {
    %c0_i32 = arith.constant 0 : i32
    %c0_i32_0 = arith.constant 0 : i32
    return %arg0, %c0_i32, %arg1 : i32, i32, i32
  }
  func.func @transform_1(%arg0: i32, %arg1: i32) -> (i32, i32) {
    %c0_i32 = arith.constant 0 : i32
    %c0_i32_0 = arith.constant 0 : i32
    %c0_i32_1 = arith.constant 0 : i32
    return %c0_i32, %c0_i32_0 : i32, i32
  }
  func.func @transform_2(%arg0: i32, %arg1: i32) -> (i32, i32) {
    %c0_i32 = arith.constant 0 : i32
    %c0_i32_0 = arith.constant 0 : i32
    %c0_i32_1 = arith.constant 0 : i32
    return %c0_i32, %c0_i32_0 : i32, i32
  }
  func.func @transform_3(%arg0: i32, %arg1: i32) -> (i32, i32) {
    %c0_i32 = arith.constant 0 : i32
    %c0_i32_0 = arith.constant 0 : i32
    %c0_i32_1 = arith.constant 0 : i32
    return %c0_i32, %c0_i32_0 : i32, i32
  }
  func.func @transform_4(%arg0: i32, %arg1: i32) -> (i32, i32, i32) {
    %c0_i32 = arith.constant 0 : i32
    %c0_i32_0 = arith.constant 0 : i32
    return %arg0, %c0_i32, %arg1 : i32, i32, i32
  }
}

</mosaic_0001>

<bundles_post_ra>
// kernel: tpu_custom_call.1
= control target key start
LH: loop header
LB: loop body
LE: loop exit
PB: predicated region body
PF: predicated region fallthrough
CT: control target
= control target key end

     0   :  { %9 = vsyncpa [#allocation3], 0  ;;  %s922_s0 = inlined_call_operand.hbm [shape: f32[2,8,256], index: 0, kind: input, shape index: {}]   ;;  %s923_s1 = inlined_call_operand.vmem [shape: f32[8,8], index: 1, kind: input, shape index: {}]   ;;  %s924_s2 = inlined_call_operand.vmem [shape: f32[8,1], index: 2, kind: input, shape index: {}]   ;;  %s925_s3 = inlined_call_operand.vmem [shape: f32[8,1], index: 3, kind: input, shape index: {}]   ;;  %s926_s4 = inlined_call_operand.hbm [shape: f32[2,8,256], index: 4, kind: output, shape index: {}]  }
   0x1   :  { %11 = vsyncpa [#allocation3 + $0x1], 0 }
   0x2   :  { %12 = vsyncpa [#allocation4], 0 }
   0x3   :  { %14 = vsyncpa [#allocation4 + $0x1], 0  ;;  %s733_s15 = smov 0   ;;  %s735_s16 = smov 0  }
   0x4   :  { %s737_s17 = smov 0   ;;  %s739_s18 = smov 0  }
   0x5   :  { %s741_s19 = smov 0   ;;  %s743_s20 = smov 0  }
   0x6 LB: > { %s487_s21 = sadd.s32 4294967295, %s696_s20   ;;  %s488_s22 = sadd.s32 4294967294, %s696_s20   ;;  %s696_s20 = sphi %s743_s20, %s20_s20   ;;  %s692_s19 = sphi %s741_s19, %s942_s19   ;;  %s688_s18 = sphi %s739_s18, %s941_s18   ;;  %s684_s17 = sphi %s737_s17, %s940_s17   ;;  %s680_s16 = sphi %s735_s16, %s939_s16   ;;  %s676_s15 = sphi %s733_s15, %s938_s15  }
   0x7   : > { %s32_s23 = sadd.s32 1, %s692_s19  ;;  %s41_s24 = sadd.s32 1, %s684_s17 }
   0x8   : > { %p34_p0 = scmp.ge.s32.totalorder %s32_s23, 2  ;;  %p48_p1 = scmp.ne.s32.totalorder %s684_s17, %s680_s16 }
   0x9   : > { %p49_p2 = scmp.eq.s32.totalorder %s696_s20, 0  ;;  %p54_p3 = scmp.ne.s32.totalorder %s680_s16, %s676_s15 }
   0xa   : > { %s944_s23 = smov (%p34_p0, %s32_s23), 0  ;;  %p55_p5 = scmp.eq.s32.totalorder %s487_s21, 0 }
   0xb   : > { %p774_p4 = por %p49_p2, %p48_p1  ;;  %s36_s26 = ssub.s32 %s692_s19, %s944_s23 }
   0xc   : > { %p143_p6 = scmp.eq.s32.totalorder %s487_s21, 1  ;;  %p39_p7 = scmp.eq.s32.totalorder %s36_s26, 0 }
   0xd   : > { %p780_p8 = por %p55_p5, %p54_p3  ;;  %p149_p10 = scmp.eq.s32.totalorder %s488_s22, 1 }
   0xe   : > { %p784_p9 = por %p143_p6, %p48_p1  ;;  %p516_p13 = scmp.lt.s32.totalorder %s696_s20, 2 }
   0xf   : > { %s789_s29 = scalar_select %p39_p7, %s684_s17, %s41_s24  }
  0x10   : > { %s930_s28 = scalar_select %p784_p9, 1, 0 }
  0x11   : > { %p791_p11 = por %p149_p10, %p54_p3  ;;  %s178_s5 = sand.u32 1, %s684_s17  }
  0x12   : > { %s491_s6 = sshll.u32 %s178_s5, 4  ;;  %s502_s7 = sshll.u32 %s692_s19, 8 }
  0x13   : > { %s931_s30 = scalar_select %p791_p11, 1, 0 }
  0x14   : > { %s802_s10 = scalar_lea.hbm %s922_s0, %s502_s7  ;;  %s182_s11 = scalar_lea.vmem [#allocation2], %s491_s6 }
  0x15   : > { %s192_s12 = sshll.u32 %s182_s11, 4  ;;  %p808_p0 = pnand %p516_p13, %p774_p4  ;;  %s804_s12 = int_to_ptr.vmem [resolvable:$true] %s192_s12 }
  0x16   : > { %s179_s14 = scalar_lea.sflag [#allocation3], %s178_s5  ;;  %s584_s21 = scalar_lea.hbm %s802_s10, 256 }
  0x17   : > { %p585_p3 = scmp.ne.s32.totalorder %s802_s10, %s584_s21  ;;  %p586_p5 = pneg %p808_p0 }
  0x18   : > { %s589_s25 = scalar_lea.hbm %s922_s0, 512  ;;  %p590_p4 = scmp.lt.u32.totalorder %s802_s10, %s922_s0 }
  0x19   : > { %p587_p6 = pnand %p586_p5, %p585_p3  ;;  %p591_p10 = scmp.lt.u32.totalorder %s589_s25, %s584_s21 }
  0x1a   : > { %p593_p12 = scmp.lt.u32.totalorder %s584_s21, %s802_s10 }
  0x1b   : > { %p588_p7 = pneg %p587_p6  ;;  %p592_p13 = por %p591_p10, %p590_p4 }
  0x1d   : > { %p594_p1 = por %p593_p12, %p592_p13 }
  0x1f   : > { %p595_p2 = pnand %p594_p1, %p588_p7 }
  0x21   : > { %598 = shalt.err (!%p595_p2)
}
  0x22   : > { %s599_s5 = scalar_lea.vmem %s804_s12, 256  ;;  %s698_s7 = smov [#allocation2]  }
  0x23   : > { %p600_p3 = scmp.ne.s32.totalorder %s804_s12, %s599_s5  ;;  %s604_s8 = sshll.u32 %s698_s7, 4  ;;  %s605_s8 = int_to_ptr.vmem [resolvable:$false] %s604_s8 }
  0x24   : > { %s606_s9 = scalar_lea.vmem %s605_s8, 512  ;;  %p607_p9 = scmp.lt.s32.totalorder %s804_s12, %s605_s8 }
  0x25   : > { %p602_p6 = pnand %p600_p3, %p586_p5  ;;  %p608_p4 = scmp.lt.s32.totalorder %s606_s9, %s599_s5 }
  0x27   : > { %p603_p11 = pneg %p602_p6  ;;  %p609_p10 = por %p608_p4, %p607_p9 }
  0x29   : > { %p610_p12 = pnand %p609_p10, %p603_p11 }
  0x2b   : > { %613 = shalt.err (!%p610_p12)
}
  0x2c   : > { %511 = dma.hbm_to_vmem [thread:$0]  (!%p808_p0), %s802_s10, 256, %s804_s12, %s179_s14  }
  0x2d   : > { %p933_p1 = scmp.lt.s32.totalorder %s696_s20, 3  ;;  %p934_p2 = scmp.ge.s32.totalorder %s696_s20, 1 }
  0x2f   : > { %p198_p5 = pnand %p934_p2, %p933_p1 }
  0x30   : > { %s844_s11 = sand.u32 (!%p198_p5), 1, %s680_s16  }
  0x31   : > { %201 = sbr.rel (%p198_p5) target bundleno = 231 (0xe7), region = 36  ;;  %s495_s21 = sshll.u32 (!%p198_p5), %s844_s11, 4 }
  0x32   : > { %s204_s22 = scalar_lea.sflag (!%p198_p5), [#allocation3], %s844_s11  ;;  %s850_s13 = scalar_lea.vmem (!%p198_p5), [#allocation2], %s495_s21 }
  0x38   : > { %667 = dma.done.wait (%p780_p8), %s204_s22, 256  }
  0x39   : > { %669 = vsyncadd (%p780_p8), %s204_s22, 4294967040  ;;  %v699_v0 = vmov 2   ;;  %v700_v1 = vmov 0   ;;  %v236_v2 = vld [vmem:[%s923_s1] sm:$0xff]  ;;  %v701_v3 = vmov 3   ;;  %v702_v4 = vmov 1  }
  0x3a   : > { %576 = vset.pattern.permute.xlu1 %v699_v0  ;;  %574 = vset.pattern.permute.xlu0 %v700_v1  ;;  %v703_v5 = vmov 4   ;;  %v704_v6 = vmov 5   ;;  %v366_v7 = vld [vmem:[%s924_s2] sm:$0xff]  ;;  %v705_v8 = vmov 6   ;;  %v706_v9 = vmov 7   ;;  %v235_v19 = vld [vmem:[%s850_s13 + $0x8] sm:$0xff] }
  0x3b   : > { %271 = vperm.xlu1 %576, %v236_v2   ;;  %239 = vperm.xlu0 %574, %v236_v2   ;;  %v374_v10 = vld [vmem:[%s925_s3] sm:$0xff]  ;;  %v242_v11 = vlaneseq  ;;  %s503_s26 = sshll.u32 %s688_s18, 8  ;;  %s231_s6 = scalar_lea.vmem [#allocation5], %s495_s21 }
  0x3c   : > { %v234_v18 = vld [vmem:[%s850_s13] sm:$0xff]  ;;  %s403_s5 = sshll.u32 %s231_s6, 4  ;;  %s873_s9 = scalar_lea.hbm %s926_s4, %s503_s26  ;;  %s875_s5 = int_to_ptr.vmem [resolvable:$true] %s403_s5 }
  0x3d   : > { %v243_v12 = vshrl.u32 %v242_v11, 7  ;;  %s387_s18 = scalar_lea.sflag [#allocation4], %s844_s11  ;;  %s614_s22 = scalar_lea.vmem %s875_s5, 256 }
  0x3e   : > { %p615_p8 = scmp.ne.s32.totalorder %s875_s5, %s614_s22  ;;  %p935_p9 = scmp.ne.s32.totalorder %s930_s28, 0 }
  0x3f   : > { %577 = vset.pattern.permute.xlu1 %v701_v3  ;;  %575 = vset.pattern.permute.xlu0 %v702_v4  ;;  %v244_v13 = vsub.s32 0, %v243_v12  ;;  %v260_v14 = vsub.s32 1, %v243_v12  ;;  %v276_v15 = vsub.s32 2, %v243_v12  ;;  %v292_v20 = vsub.s32 3, %v243_v12  ;;  %s707_s21 = smov [#allocation5]  }
  0x40   : > { %287 = vperm.xlu1 %577, %v236_v2   ;;  %255 = vperm.xlu0 %575, %v236_v2   ;;  %v308_v25 = vsub.s32 4, %v243_v12  ;;  %v324_v32 = vsub.s32 5, %v243_v12  ;;  %v340_v45 = vsub.s32 6, %v243_v12  ;;  %v356_v56 = vsub.s32 7, %v243_v12  ;;  %p616_p11 = pnand %p615_p8, %p935_p9  ;;  %s618_s13 = sshll.u32 %s707_s21, 4  ;;  %s619_s13 = int_to_ptr.vmem [resolvable:$false] %s618_s13 }
  0x41   : > { %v245_v21 = vrot.slane %v234_v18, %v244_v13  ;;  %v249_v22 = vrot.slane %v235_v19, %v244_v13  ;;  %v261_v23 = vrot.slane %v234_v18, %v260_v14  ;;  %v265_v24 = vrot.slane %v235_v19, %v260_v14  ;;  %s620_s10 = scalar_lea.vmem %s619_s13, 512  ;;  %p621_p7 = scmp.lt.s32.totalorder %s875_s5, %s619_s13 }
  0x42   : > { %v277_v26 = vrot.slane %v234_v18, %v276_v15  ;;  %v281_v27 = vrot.slane %v235_v19, %v276_v15  ;;  %v293_v29 = vrot.slane %v234_v18, %v292_v20  ;;  %v297_v30 = vrot.slane %v235_v19, %v292_v20  ;;  %p617_p0 = pneg %p616_p11  ;;  %p622_p13 = scmp.lt.s32.totalorder %s620_s10, %s614_s22 }
  0x43   : > { %v309_v37 = vrot.slane %v234_v18, %v308_v25  ;;  %v313_v38 = vrot.slane %v235_v19, %v308_v25  ;;  %v325_v43 = vrot.slane %v234_v18, %v324_v32  ;;  %v329_v44 = vrot.slane %v235_v19, %v324_v32 }
  0x44   : > { %578 = vset.pattern.permute.xlu1 %v703_v5  ;;  %579 = vset.pattern.permute.xlu0 %v704_v6  ;;  %v341_v59 = vrot.slane %v234_v18, %v340_v45  ;;  %v345_v60 = vrot.slane %v235_v19, %v340_v45  ;;  %v357_v0 = vrot.slane %v234_v18, %v356_v56  ;;  %p623_p3 = por %p622_p13, %p621_p7 }
  0x45   : > { %303 = vperm.xlu1 %578, %v236_v2   ;;  %319 = vperm.xlu0 %579, %v236_v2  }
  0x46   : > { %p624_p6 = pnand %p623_p3, %p617_p0 }
  0x49   : > { %580 = vset.pattern.permute.xlu1 %v705_v8  ;;  %582 = vset.pattern.permute.xlu0 %v700_v1 }
  0x4a   : > { %335 = vperm.xlu1 %580, %v236_v2   ;;  %369 = vperm.xlu0 %582, %v366_v7  }
  0x4e   : > { %581 = vset.pattern.permute.xlu1 %v706_v9 }
  0x4f   : > { %351 = vperm.xlu1 %581, %v236_v2  }
  0x53   : > { %583 = vset.pattern.permute.xlu1 %v700_v1  ;;  %v361_v1 = vrot.slane %v235_v19, %v356_v56 }
  0x54   : > { %377 = vperm.xlu1 %583, %v374_v10  }
  0xba   : > { %v272_v16 = vpop.permute.xlu1 %271  ;;  %v240_v17 = vpop.permute.xlu0 %239 }
  0xbb   : > { %v250_v33 = vmul.f32 %v245_v21, %v240_v17  ;;  %v251_v34 = vmul.f32 %v249_v22, %v240_v17  ;;  %v282_v39 = vmul.f32 %v277_v26, %v272_v16  ;;  %v283_v40 = vmul.f32 %v281_v27, %v272_v16 }
  0xbf   : > { %v288_v28 = vpop.permute.xlu1 %287  ;;  %v256_v31 = vpop.permute.xlu0 %255 }
  0xc0   : > { %v266_v35 = vmul.f32 %v261_v23, %v256_v31  ;;  %v267_v36 = vmul.f32 %v265_v24, %v256_v31  ;;  %v298_v46 = vmul.f32 %v293_v29, %v288_v28  ;;  %v299_v47 = vmul.f32 %v297_v30, %v288_v28 }
  0xc2   : > { %v268_v41 = vadd.f32 %v266_v35, %v250_v33  ;;  %v269_v42 = vadd.f32 %v267_v36, %v251_v34 }
  0xc4   : > { %v284_v48 = vadd.f32 %v282_v39, %v268_v41  ;;  %v285_v49 = vadd.f32 %v283_v40, %v269_v42  ;;  %v304_v50 = vpop.permute.xlu1 %303  ;;  %v320_v51 = vpop.permute.xlu0 %319 }
  0xc5   : > { %v314_v52 = vmul.f32 %v309_v37, %v304_v50  ;;  %v315_v53 = vmul.f32 %v313_v38, %v304_v50  ;;  %v330_v57 = vmul.f32 %v325_v43, %v320_v51  ;;  %v331_v58 = vmul.f32 %v329_v44, %v320_v51 }
  0xc6   : > { %v300_v54 = vadd.f32 %v298_v46, %v284_v48  ;;  %v301_v55 = vadd.f32 %v299_v47, %v285_v49 }
  0xc8   : > { %v316_v61 = vadd.f32 %v314_v52, %v300_v54  ;;  %v317_v62 = vadd.f32 %v315_v53, %v301_v55 }
  0xc9   : > { %v336_v63 = vpop.permute.xlu1 %335  ;;  %v370_v11 = vpop.permute.xlu0 %369 }
  0xca   : > { %v332_v2 = vadd.f32 %v330_v57, %v316_v61  ;;  %v333_v3 = vadd.f32 %v331_v58, %v317_v62  ;;  %v346_v4 = vmul.f32 %v341_v59, %v336_v63  ;;  %v347_v5 = vmul.f32 %v345_v60, %v336_v63 }
  0xcc   : > { %v348_v7 = vadd.f32 %v346_v4, %v332_v2  ;;  %v349_v8 = vadd.f32 %v347_v5, %v333_v3 }
  0xce   : > { %v352_v6 = vpop.permute.xlu1 %351 }
  0xcf   : > { %v362_v9 = vmul.f32 %v357_v0, %v352_v6  ;;  %v363_v10 = vmul.f32 %v361_v1, %v352_v6 }
  0xd1   : > { %v364_v12 = vadd.f32 %v362_v9, %v348_v7  ;;  %v365_v13 = vadd.f32 %v363_v10, %v349_v8 }
  0xd3   : > { %v372_v14 = vmul.f32 %v370_v11, %v364_v12  ;;  %v373_v15 = vmul.f32 %v370_v11, %v365_v13  ;;  %v378_v16 = vpop.permute.xlu1 %377 }
  0xd5   : > { %v380_v17 = vadd.f32 %v378_v16, %v372_v14  ;;  %v381_v18 = vadd.f32 %v378_v16, %v373_v15 }
  0xd7   : > { %v382_v19 = vmax.f32 %v380_v17, 0.0  ;;  %v383_v20 = vmax.f32 %v381_v18, 0.0 }
  0xd9   : > { %384 = vst [vmem:[%s231_s6] sm:$0xff] %v382_v19  ;;  %385 = vst [vmem:[%s231_s6 + $0x8] sm:$0xff] %v383_v20 }
  0xda   : > { %627 = shalt.err (!%p624_p6)
}
  0xdb   : > { %s628_s11 = scalar_lea.hbm %s873_s9, 256  ;;  %s632_s14 = scalar_lea.hbm %s926_s4, 512 }
  0xdc   : > { %p629_p4 = scmp.ne.s32.totalorder %s873_s9, %s628_s11  ;;  %p633_p1 = scmp.lt.u32.totalorder %s873_s9, %s926_s4 }
  0xdd   : > { %p634_p2 = scmp.lt.u32.totalorder %s632_s14, %s628_s11  ;;  %p636_p8 = scmp.lt.u32.totalorder %s628_s11, %s873_s9 }
  0xde   : > { %p630_p10 = pnand %p629_p4, %p935_p9 }
  0xdf   : > { %p635_p5 = por %p634_p2, %p633_p1 }
  0xe0   : > { %p631_p12 = pneg %p630_p10 }
  0xe1   : > { %p637_p11 = por %p636_p8, %p635_p5 }
  0xe3   : > { %p638_p0 = pnand %p637_p11, %p631_p12 }
  0xe5   : > { %641 = shalt.err (!%p638_p0)
}
  0xe6   : > { %506 = dma.vmem_to_hbm [thread:$0]  (%p935_p9), %s875_s5, 256, %s873_s9, %s387_s18  }
  0xe7 PF: > { %s415_s26 = sand.u32 1, %s676_s15   ;;  %p936_p7 = scmp.ne.s32.totalorder %s931_s30, 0 }
  0xe8   : > { %p937_p13 = scmp.ge.s32.totalorder %s696_s20, 2  ;;  %s416_s6 = scalar_lea.sflag [#allocation4], %s415_s26 }
  0xea   : > { %p513_p3 = pnand %p937_p13, %p936_p7 }
  0xec   : > { %671 = dma.done.wait (!%p513_p3), %s416_s6, 256  }
  0xed   : > { %673 = vsyncadd (!%p513_p3), %s416_s6, 4294967040  ;;  %s20_s20 = sadd.s32 1, %s696_s20   ;;  %s938_s15 = smov %s680_s16 }
  0xee   : > { %p17_p6 = scmp.ge.s32.totalorder %s20_s20, 4   ;;  %s939_s16 = smov %s684_s17 }
  0xef   : > { %s940_s17 = smov %s789_s29  ;;  %s941_s18 = smov %s692_s19 }
  0xf0   : > { %s942_s19 = smov %s944_s23  ;;  %19 = sbr.rel (!%p17_p6) target bundleno = 6 (0x6), region = 81 }
  0xf7   :  { %421 = vsyncpa [#allocation3], 1 }
  0xf8   :  { %423 = vsyncpa [#allocation3 + $0x1], 1 }
  0xf9   :  { %424 = vsyncpa [#allocation4], 1 }
  0xfa   :  { %426 = vsyncpa [#allocation4 + $0x1], 1 }

</bundles_post_ra>
